<compile_context>
chip_gen: v7x
topology: tpu7x:2x2x1
jax: 0.10.0
libtpu: 0.0.40
codegen_flags: <defaults>
</compile_context>

<pallas_src>
import functools

import jax
import jax.numpy as jnp
from jax.experimental import pallas as pl
from jax.experimental.pallas import tpu as pltpu

_EPS = 1e-5


# ----------------------------------------------------------------------------
# Fused SENet block kernel (one grid step == one image)
# ----------------------------------------------------------------------------
def _senet_block_kernel(x_ref, w1_ref, b1_ref, sb_ref, w2_ref, b2_ref,
                        fw1_ref, fb1_ref, fw2_ref, fb2_ref, o_ref, *, width):
    # x_ref  : (1, H, W*Cin)        bf16  lane-dense NHWC rows of one image
    # w1_ref : (3*W*Cin, 2*W*C)     bf16  banded conv1 weight ++ fused shortcut cols
    # b1_ref : (1, W*C)             f32   folded BN1 bias, W-tiled
    # sb_ref : (1, W*C)             f32   folded shortcut-BN bias, W-tiled
    # w2_ref : (3*W*C, W*C)         bf16  banded conv2 weight
    # b2_ref : (1, W*C)             f32   folded BN2 bias, W-tiled
    # fw1_ref: (Cr, W*C) f32  SE fc1 weight, W-tiled;  fb1_ref: (Cr, 1) f32
    # fw2_ref: (Cr, W*C) f32  SE fc2 weight, W-tiled;  fb2_ref: (1, W*C) f32
    # o_ref  : (1, H, W*C)          f32   lane-dense output rows
    H = x_ref.shape[1]
    L = o_ref.shape[2]                       # W * C
    inv_hw = 1.0 / (H * width)

    def shift_cat(rows):
        # rows: (H, K) -> (H, 3K); cols [0:K]=row y-1, [K:2K]=row y, [2K:3K]=row y+1
        # (zero rows at the H boundary == SAME padding in H; SAME padding in W
        #  is encoded in the banded weight itself).
        z = jnp.zeros((1, rows.shape[1]), rows.dtype)
        up = jnp.concatenate([z, rows[:H - 1]], axis=0)
        dn = jnp.concatenate([rows[1:], z], axis=0)
        return jnp.concatenate([up, rows, dn], axis=1)

    # ---- conv1 + bn1 + relu, with the 1x1 shortcut fused into the same matmul
    x = x_ref[0]                                                 # (H, W*Cin) bf16
    r1 = jnp.dot(shift_cat(x), w1_ref[...],
                 preferred_element_type=jnp.float32)             # (H, 2*W*C) f32
    out1 = jnp.maximum(r1[:, :L] + b1_ref[...], 0.0)             # (H, W*C)
    shortcut = r1[:, L:] + sb_ref[...]                           # (H, W*C)

    # ---- conv2 + bn2 + relu --------------------------------------------------
    r2 = jnp.dot(shift_cat(out1.astype(x.dtype)), w2_ref[...],
                 preferred_element_type=jnp.float32)             # (H, W*C) f32
    out2 = jnp.maximum(r2 + b2_ref[...], 0.0)

    # ---- SE: global average pool + fc1/relu + fc2/sigmoid (VPU/XLU only) ----
    # pooled[w*C+c] = (1/(H*W)) * sum_y out2[y, w*C+c]; the lane-sum against the
    # W-tiled fc1 weight below also aggregates over w, yielding the channel mean.
    pooled = jnp.sum(out2, axis=0, keepdims=True) * inv_hw       # (1, W*C)
    h = jnp.maximum(jnp.sum(fw1_ref[...] * pooled, axis=1, keepdims=True)
                    + fb1_ref[...], 0.0)                         # (Cr, 1)
    gate = jax.nn.sigmoid(jnp.sum(fw2_ref[...] * h, axis=0, keepdims=True)
                          + fb2_ref[...])                        # (1, W*C)

    # ---- gate + residual + final ReLU, stored lane-dense ---------------------
    o_ref[0] = jnp.maximum(out2 * gate + shortcut, 0.0)


# ----------------------------------------------------------------------------
# Parameter setup (deterministic, synthetic) and block forward
# ----------------------------------------------------------------------------
def _bn_fold(gamma, beta, mean, var):
    scale = gamma / jnp.sqrt(var + _EPS)
    return scale, beta - mean * scale


def init_params(key, in_planes, planes, r=16):
    c = planes
    cr = max(c // r, 1)
    ks = jax.random.split(key, 12)

    def bn_params(k):
        k1, k2, k3, k4 = jax.random.split(k, 4)
        gamma = 1.0 + 0.1 * jax.random.normal(k1, (c,), jnp.float32)
        beta = 0.1 * jax.random.normal(k2, (c,), jnp.float32)
        mean = 0.1 * jax.random.normal(k3, (c,), jnp.float32)
        var = 0.5 + jax.random.uniform(k4, (c,), jnp.float32)
        return gamma, beta, mean, var

    return {
        "conv1_w": 0.1 * jax.random.normal(ks[0], (c, in_planes, 3, 3), jnp.float32),
        "bn1": bn_params(ks[1]),
        "conv2_w": 0.1 * jax.random.normal(ks[2], (c, c, 3, 3), jnp.float32),
        "bn2": bn_params(ks[3]),
        "sc_w": 0.1 * jax.random.normal(ks[4], (c, in_planes, 1, 1), jnp.float32),
        "bn_s": bn_params(ks[5]),
        "fc1_w": 0.1 * jax.random.normal(ks[6], (cr, c, 1, 1), jnp.float32),
        "fc1_b": 0.1 * jax.random.normal(ks[7], (cr,), jnp.float32),
        "fc2_w": 0.1 * jax.random.normal(ks[8], (c, cr, 1, 1), jnp.float32),
        "fc2_b": 0.1 * jax.random.normal(ks[9], (c,), jnp.float32),
    }


def senet_block_forward(x_nchw, p, in_planes, planes):
    """Fused Pallas forward. x_nchw: (B, Cin, H, W) f32 -> (B, C, H, W) f32."""
    x = jnp.transpose(x_nchw, (0, 2, 3, 1))                      # NHWC (glue)
    B, H, W, _ = x.shape
    cin, c = in_planes, planes
    cr = p["fc1_b"].shape[0]
    L = W * c                                                    # lane-dense width
    hi = jax.lax.Precision.HIGHEST

    # ---- fold BN (eval mode) and build scale-folded conv kernels ------------
    s1, b1 = _bn_fold(*p["bn1"])
    s2, b2 = _bn_fold(*p["bn2"])
    ss, sb = _bn_fold(*p["bn_s"])
    k1 = jnp.transpose(p["conv1_w"], (2, 3, 1, 0)) * s1          # (3,3,cin,c)
    k2 = jnp.transpose(p["conv2_w"], (2, 3, 1, 0)) * s2          # (3,3,c,c)
    ws = p["sc_w"][:, :, 0, 0].T * ss                            # (cin, c)

    # ---- block-banded "row conv" weights: (3*W*Ci, W*Co) ---------------------
    xs = jnp.arange(W)
    sel = (xs[:, None, None] ==
           xs[None, :, None] + jnp.arange(3)[None, None, :] - 1).astype(jnp.float32)

    def band(k, ci, co):                                         # sel[x',x,kx]*k[ky,kx,...]
        m = jnp.einsum('pqd,kdio->kpiqo', sel, k, precision=hi)  # (3,W,ci,W,co)
        return m.reshape(3 * W * ci, W * co)

    w1_band = band(k1, cin, c)                                   # (3*W*cin, W*c)
    w2_band = band(k2, c, c)                                     # (3*W*c,   W*c)

    # fuse the 1x1 shortcut into conv1's RHS (extra N cols, dy=0 rows only)
    sc_bd = jnp.einsum('pq,io->piqo', jnp.eye(W), ws,
                       precision=hi).reshape(W * cin, L)
    sc_cols = jnp.concatenate(
        [jnp.zeros((W * cin, L)), sc_bd, jnp.zeros((W * cin, L))], axis=0)
    w1_full = jnp.concatenate([w1_band, sc_cols], axis=1)        # (3*W*cin, 2L)

    # ---- lane-dense (W-tiled) biases and SE parameters -----------------------
    tile_w = lambda v: jnp.tile(v, W).reshape(1, L)
    b1_wc, b2_wc, sb_wc = tile_w(b1), tile_w(b2), tile_w(sb)
    fw1 = jnp.tile(p["fc1_w"][:, :, 0, 0], (1, W))               # (cr, L)
    fb1 = p["fc1_b"].reshape(cr, 1)
    fw2 = jnp.tile(p["fc2_w"][:, :, 0, 0].T, (1, W))             # (cr, L)
    fb2_wc = tile_w(p["fc2_b"])

    x_lane = x.reshape(B, H, W * cin).astype(jnp.bfloat16)       # lane-dense rows

    def const(shape):
        return pl.BlockSpec(shape, lambda b, _s=shape: (0,) * len(_s))

    y = pl.pallas_call(
        functools.partial(_senet_block_kernel, width=W),
        out_shape=jax.ShapeDtypeStruct((B, H, L), jnp.float32),
        grid=(B,),
        in_specs=[
            pl.BlockSpec((1, H, W * cin), lambda b: (b, 0, 0)),  # activations
            const((3 * W * cin, 2 * L)),                         # conv1 ++ shortcut
            const((1, L)), const((1, L)),                        # b1, sb
            const((3 * W * c, L)), const((1, L)),                # conv2, b2
            const((cr, L)), const((cr, 1)),                      # fc1 w/b
            const((cr, L)), const((1, L)),                       # fc2 w/b
        ],
        out_specs=pl.BlockSpec((1, H, L), lambda b: (b, 0, 0)),
        compiler_params=pltpu.CompilerParams(
            dimension_semantics=("parallel",)),
    )(x_lane,
      w1_full.astype(jnp.bfloat16), b1_wc, sb_wc,
      w2_band.astype(jnp.bfloat16), b2_wc,
      fw1, fb1, fw2, fb2_wc)

    # (B, H, W*C) -> (B, C, H, W); the reshape is free (bytes identical to NHWC).
    return jnp.transpose(y.reshape(B, H, W, c), (0, 3, 1, 2))


# ----------------------------------------------------------------------------
# Pure-JAX reference (NCHW) for a correctness sanity check
# ----------------------------------------------------------------------------
def reference_forward(x, p):
    dn = ("NCHW", "OIHW", "NCHW")

    def conv(a, w, pad):
        return jax.lax.conv_general_dilated(
            a, w, (1, 1), ((pad, pad), (pad, pad)), dimension_numbers=dn,
            precision=jax.lax.Precision.HIGHEST)

    def bn(a, gamma, beta, mean, var):
        return ((a - mean[None, :, None, None])
                / jnp.sqrt(var[None, :, None, None] + _EPS)
                * gamma[None, :, None, None] + beta[None, :, None, None])

    relu = lambda t: jnp.maximum(t, 0.0)

    shortcut = bn(conv(x, p["sc_w"], 0), *p["bn_s"])
    out = relu(bn(conv(x, p["conv1_w"], 1), *p["bn1"]))
    out = relu(bn(conv(out, p["conv2_w"], 1), *p["bn2"]))
    w = jnp.mean(out, axis=(2, 3), keepdims=True)
    w = relu(conv(w, p["fc1_w"], 0) + p["fc1_b"][None, :, None, None])
    w = jax.nn.sigmoid(conv(w, p["fc2_w"], 0) + p["fc2_b"][None, :, None, None])
    return relu(out * w + shortcut)


if __name__ == "__main__":
    B, IN_PLANES, PLANES, H, W, R = 2, 16, 32, 8, 8, 16

    key = jax.random.PRNGKey(0)
    kx, kp = jax.random.split(key)
    x = jax.random.normal(kx, (B, IN_PLANES, H, W), jnp.float32)   # NCHW input
    params = init_params(kp, IN_PLANES, PLANES, r=R)

    fwd = jax.jit(functools.partial(senet_block_forward,
                                    in_planes=IN_PLANES, planes=PLANES))
    out = jax.block_until_ready(fwd(x, params))

    ref = jax.block_until_ready(reference_forward(x, params))
    err = float(jnp.max(jnp.abs(out - ref)))
    assert out.shape == (B, PLANES, H, W), out.shape
    # bf16 MXU inputs (f32 accumulation) vs f32 HIGHEST-precision XLA reference.
    assert err < 6e-2, f"mismatch vs reference: max abs err = {err}"

    print("KERNEL_OK")
</pallas_src>

<mosaic_0001>
module attributes {stable_mosaic.version = 11 : i64} {
  func.func @_senet_block_kernel(%arg0: i32, %arg1: memref<1x8x128xbf16, #tpu.memory_space<vmem>>, %arg2: memref<384x512xbf16, #tpu.memory_space<vmem>>, %arg3: memref<1x256xf32, #tpu.memory_space<vmem>>, %arg4: memref<1x256xf32, #tpu.memory_space<vmem>>, %arg5: memref<768x256xbf16, #tpu.memory_space<vmem>>, %arg6: memref<1x256xf32, #tpu.memory_space<vmem>>, %arg7: memref<2x256xf32, #tpu.memory_space<vmem>>, %arg8: memref<2x1xf32, #tpu.memory_space<vmem>>, %arg9: memref<2x256xf32, #tpu.memory_space<vmem>>, %arg10: memref<1x256xf32, #tpu.memory_space<vmem>>, %arg11: memref<1x8x256xf32, #tpu.memory_space<vmem>>) attributes {dimension_semantics = [#tpu.dimension_semantics<parallel>], iteration_bounds = array<i64: 2>, scalar_prefetch = 0 : i64, scratch_operands = 0 : i64, tpu.core_type = #tpu.core_type<tc>, window_params = [{transform_indices = @transform_0, window_bounds = array<i64: 1, 8, 128>}, {pipeline_mode = #tpu.pipeline_mode<synchronous>, transform_indices = @transform_1, window_bounds = array<i64: 384, 512>}, {pipeline_mode = #tpu.pipeline_mode<synchronous>, transform_indices = @transform_2, window_bounds = array<i64: 1, 256>}, {pipeline_mode = #tpu.pipeline_mode<synchronous>, transform_indices = @transform_3, window_bounds = array<i64: 1, 256>}, {pipeline_mode = #tpu.pipeline_mode<synchronous>, transform_indices = @transform_4, window_bounds = array<i64: 768, 256>}, {pipeline_mode = #tpu.pipeline_mode<synchronous>, transform_indices = @transform_5, window_bounds = array<i64: 1, 256>}, {pipeline_mode = #tpu.pipeline_mode<synchronous>, transform_indices = @transform_6, window_bounds = array<i64: 2, 256>}, {pipeline_mode = #tpu.pipeline_mode<synchronous>, transform_indices = @transform_7, window_bounds = array<i64: 2, 1>}, {pipeline_mode = #tpu.pipeline_mode<synchronous>, transform_indices = @transform_8, window_bounds = array<i64: 2, 256>}, {pipeline_mode = #tpu.pipeline_mode<synchronous>, transform_indices = @transform_9, window_bounds = array<i64: 1, 256>}, {transform_indices = @transform_10, window_bounds = array<i64: 1, 8, 256>}]} {
    %c0 = arith.constant 0 : index
    %c0_0 = arith.constant 0 : index
    %c0_1 = arith.constant 0 : index
    %0 = vector.load %arg1[%c0, %c0_0, %c0_1] : memref<1x8x128xbf16, #tpu.memory_space<vmem>>, vector<1x8x128xbf16>
    %1 = vector.shape_cast %0 : vector<1x8x128xbf16> to vector<8x128xbf16>
    %cst = arith.constant 0.000000e+00 : bf16
    %2 = vector.broadcast %cst : bf16 to vector<1x128xbf16>
    %3 = vector.extract_strided_slice %1 {offsets = [0, 0], sizes = [7, 128], strides = [1, 1]} : vector<8x128xbf16> to vector<7x128xbf16>
    %4 = tpu.concatenate %2, %3 in 0 : vector<1x128xbf16>, vector<7x128xbf16> -> vector<8x128xbf16>
    %5 = vector.extract_strided_slice %1 {offsets = [1, 0], sizes = [7, 128], strides = [1, 1]} : vector<8x128xbf16> to vector<7x128xbf16>
    %6 = tpu.concatenate %5, %2 in 0 : vector<7x128xbf16>, vector<1x128xbf16> -> vector<8x128xbf16>
    %7 = tpu.concatenate %4, %1, %6 in 1 : vector<8x128xbf16>, vector<8x128xbf16>, vector<8x128xbf16> -> vector<8x384xbf16>
    %c0_2 = arith.constant 0 : index
    %c0_3 = arith.constant 0 : index
    %8 = vector.load %arg2[%c0_2, %c0_3] : memref<384x512xbf16, #tpu.memory_space<vmem>>, vector<384x512xbf16>
    %cst_4 = arith.constant dense<0.000000e+00> : vector<8x512xf32>
    %9 = tpu.matmul %7, %8, %cst_4 {dimension_numbers = #tpu.dot_dimension_numbers<[1], [0], [0], [1], [0, 0, 1, 1], [], []>} : vector<8x384xbf16>, vector<384x512xbf16>, vector<8x512xf32> -> vector<8x512xf32>
    %10 = vector.extract_strided_slice %9 {offsets = [0, 0], sizes = [8, 256], strides = [1, 1]} : vector<8x512xf32> to vector<8x256xf32>
    %c0_5 = arith.constant 0 : index
    %c0_6 = arith.constant 0 : index
    %11 = vector.load %arg3[%c0_5, %c0_6] : memref<1x256xf32, #tpu.memory_space<vmem>>, vector<1x256xf32>
    %12 = vector.broadcast %11 : vector<1x256xf32> to vector<8x256xf32>
    %13 = arith.addf %10, %12 : vector<8x256xf32>
    %cst_7 = arith.constant 0.000000e+00 : f32
    %14 = vector.broadcast %cst_7 : f32 to vector<8x256xf32>
    %15 = arith.maximumf %13, %14 : vector<8x256xf32>
    %16 = vector.extract_strided_slice %9 {offsets = [0, 256], sizes = [8, 256], strides = [1, 1]} : vector<8x512xf32> to vector<8x256xf32>
    %c0_8 = arith.constant 0 : index
    %c0_9 = arith.constant 0 : index
    %17 = vector.load %arg4[%c0_8, %c0_9] : memref<1x256xf32, #tpu.memory_space<vmem>>, vector<1x256xf32>
    %18 = vector.broadcast %17 : vector<1x256xf32> to vector<8x256xf32>
    %19 = arith.addf %16, %18 : vector<8x256xf32>
    %20 = arith.truncf %15 : vector<8x256xf32> to vector<8x256xbf16>
    %cst_10 = arith.constant 0.000000e+00 : bf16
    %21 = vector.broadcast %cst_10 : bf16 to vector<1x256xbf16>
    %22 = vector.extract_strided_slice %20 {offsets = [0, 0], sizes = [7, 256], strides = [1, 1]} : vector<8x256xbf16> to vector<7x256xbf16>
    %23 = tpu.concatenate %21, %22 in 0 : vector<1x256xbf16>, vector<7x256xbf16> -> vector<8x256xbf16>
    %24 = vector.extract_strided_slice %20 {offsets = [1, 0], sizes = [7, 256], strides = [1, 1]} : vector<8x256xbf16> to vector<7x256xbf16>
    %25 = tpu.concatenate %24, %21 in 0 : vector<7x256xbf16>, vector<1x256xbf16> -> vector<8x256xbf16>
    %26 = tpu.concatenate %23, %20, %25 in 1 : vector<8x256xbf16>, vector<8x256xbf16>, vector<8x256xbf16> -> vector<8x768xbf16>
    %c0_11 = arith.constant 0 : index
    %c0_12 = arith.constant 0 : index
    %27 = vector.load %arg5[%c0_11, %c0_12] : memref<768x256xbf16, #tpu.memory_space<vmem>>, vector<768x256xbf16>
    %cst_13 = arith.constant dense<0.000000e+00> : vector<8x256xf32>
    %28 = tpu.matmul %26, %27, %cst_13 {dimension_numbers = #tpu.dot_dimension_numbers<[1], [0], [0], [1], [0, 0, 1, 1], [], []>} : vector<8x768xbf16>, vector<768x256xbf16>, vector<8x256xf32> -> vector<8x256xf32>
    %c0_14 = arith.constant 0 : index
    %c0_15 = arith.constant 0 : index
    %29 = vector.load %arg6[%c0_14, %c0_15] : memref<1x256xf32, #tpu.memory_space<vmem>>, vector<1x256xf32>
    %30 = vector.broadcast %29 : vector<1x256xf32> to vector<8x256xf32>
    %31 = arith.addf %28, %30 : vector<8x256xf32>
    %cst_16 = arith.constant 0.000000e+00 : f32
    %32 = vector.broadcast %cst_16 : f32 to vector<8x256xf32>
    %33 = arith.maximumf %31, %32 : vector<8x256xf32>
    %cst_17 = arith.constant dense<0.000000e+00> : vector<256xf32>
    %34 = vector.multi_reduction <add>, %33, %cst_17 [0] : vector<8x256xf32> to vector<256xf32>
    %35 = vector.shape_cast %34 : vector<256xf32> to vector<1x256xf32>
    %cst_18 = arith.constant 1.562500e-02 : f32
    %36 = vector.broadcast %cst_18 : f32 to vector<1x256xf32>
    %37 = arith.mulf %35, %36 : vector<1x256xf32>
    %c0_19 = arith.constant 0 : index
    %c0_20 = arith.constant 0 : index
    %38 = vector.load %arg7[%c0_19, %c0_20] : memref<2x256xf32, #tpu.memory_space<vmem>>, vector<2x256xf32>
    %39 = vector.broadcast %37 : vector<1x256xf32> to vector<2x256xf32>
    %40 = arith.mulf %38, %39 : vector<2x256xf32>
    %cst_21 = arith.constant dense<0.000000e+00> : vector<2xf32>
    %41 = vector.multi_reduction <add>, %40, %cst_21 [1] : vector<2x256xf32> to vector<2xf32>
    %42 = vector.shape_cast %41 : vector<2xf32> to vector<2x1xf32>
    %c0_22 = arith.constant 0 : index
    %c0_23 = arith.constant 0 : index
    %43 = vector.load %arg8[%c0_22, %c0_23] : memref<2x1xf32, #tpu.memory_space<vmem>>, vector<2x1xf32>
    %44 = arith.addf %42, %43 : vector<2x1xf32>
    %cst_24 = arith.constant 0.000000e+00 : f32
    %45 = vector.broadcast %cst_24 : f32 to vector<2x1xf32>
    %46 = arith.maximumf %44, %45 : vector<2x1xf32>
    %c0_25 = arith.constant 0 : index
    %c0_26 = arith.constant 0 : index
    %47 = vector.load %arg9[%c0_25, %c0_26] : memref<2x256xf32, #tpu.memory_space<vmem>>, vector<2x256xf32>
    %48 = vector.broadcast %46 : vector<2x1xf32> to vector<2x256xf32>
    %49 = arith.mulf %47, %48 : vector<2x256xf32>
    %cst_27 = arith.constant dense<0.000000e+00> : vector<256xf32>
    %50 = vector.multi_reduction <add>, %49, %cst_27 [0] : vector<2x256xf32> to vector<256xf32>
    %51 = vector.shape_cast %50 : vector<256xf32> to vector<1x256xf32>
    %c0_28 = arith.constant 0 : index
    %c0_29 = arith.constant 0 : index
    %52 = vector.load %arg10[%c0_28, %c0_29] : memref<1x256xf32, #tpu.memory_space<vmem>>, vector<1x256xf32>
    %53 = arith.addf %51, %52 : vector<1x256xf32>
    %54 = arith.negf %53 : vector<1x256xf32>
    %55 = math.exp %54 : vector<1x256xf32>
    %cst_30 = arith.constant 1.000000e+00 : f32
    %56 = vector.broadcast %cst_30 : f32 to vector<1x256xf32>
    %57 = arith.addf %56, %55 : vector<1x256xf32>
    %58 = arith.divf %56, %57 : vector<1x256xf32>
    %59 = vector.broadcast %58 : vector<1x256xf32> to vector<8x256xf32>
    %60 = arith.mulf %33, %59 : vector<8x256xf32>
    %61 = arith.addf %60, %19 : vector<8x256xf32>
    %cst_31 = arith.constant 0.000000e+00 : f32
    %62 = vector.broadcast %cst_31 : f32 to vector<8x256xf32>
    %63 = arith.maximumf %61, %62 : vector<8x256xf32>
    %c0_32 = arith.constant 0 : index
    %c0_33 = arith.constant 0 : index
    %c0_34 = arith.constant 0 : index
    %64 = vector.load %arg11[%c0_32, %c0_33, %c0_34] : memref<1x8x256xf32, #tpu.memory_space<vmem>>, vector<1x8x256xf32>
    %65 = vector.shape_cast %64 : vector<1x8x256xf32> to vector<8x256xf32>
    %66 = vector.shape_cast %63 : vector<8x256xf32> to vector<1x8x256xf32>
    tpu.vector_store %arg11[%c0_32, %c0_33, %c0_34], %66 {strides = array<i32>} : memref<1x8x256xf32, #tpu.memory_space<vmem>>, vector<1x8x256xf32>,
    return
  }
  func.func @transform_0(%arg0: i32) -> (i32, i32, i32) {
    %c0_i32 = arith.constant 0 : i32
    %c0_i32_0 = arith.constant 0 : i32
    %c0_i32_1 = arith.constant 0 : i32
    return %arg0, %c0_i32, %c0_i32_0 : i32, i32, i32
  }
  func.func @transform_1(%arg0: i32) -> (i32, i32) {
    %c0_i32 = arith.constant 0 : i32
    %c0_i32_0 = arith.constant 0 : i32
    %c0_i32_1 = arith.constant 0 : i32
    return %c0_i32, %c0_i32_0 : i32, i32
  }
  func.func @transform_2(%arg0: i32) -> (i32, i32) {
    %c0_i32 = arith.constant 0 : i32
    %c0_i32_0 = arith.constant 0 : i32
    %c0_i32_1 = arith.constant 0 : i32
    return %c0_i32, %c0_i32_0 : i32, i32
  }
  func.func @transform_3(%arg0: i32) -> (i32, i32) {
    %c0_i32 = arith.constant 0 : i32
    %c0_i32_0 = arith.constant 0 : i32
    %c0_i32_1 = arith.constant 0 : i32
    return %c0_i32, %c0_i32_0 : i32, i32
  }
  func.func @transform_4(%arg0: i32) -> (i32, i32) {
    %c0_i32 = arith.constant 0 : i32
    %c0_i32_0 = arith.constant 0 : i32
    %c0_i32_1 = arith.constant 0 : i32
    return %c0_i32, %c0_i32_0 : i32, i32
  }
  func.func @transform_5(%arg0: i32) -> (i32, i32) {
    %c0_i32 = arith.constant 0 : i32
    %c0_i32_0 = arith.constant 0 : i32
    %c0_i32_1 = arith.constant 0 : i32
    return %c0_i32, %c0_i32_0 : i32, i32
  }
  func.func @transform_6(%arg0: i32) -> (i32, i32) {
    %c0_i32 = arith.constant 0 : i32
    %c0_i32_0 = arith.constant 0 : i32
    %c0_i32_1 = arith.constant 0 : i32
    return %c0_i32, %c0_i32_0 : i32, i32
  }
  func.func @transform_7(%arg0: i32) -> (i32, i32) {
    %c0_i32 = arith.constant 0 : i32
    %c0_i32_0 = arith.constant 0 : i32
    %c0_i32_1 = arith.constant 0 : i32
    return %c0_i32, %c0_i32_0 : i32, i32
  }
  func.func @transform_8(%arg0: i32) -> (i32, i32) {
    %c0_i32 = arith.constant 0 : i32
    %c0_i32_0 = arith.constant 0 : i32
    %c0_i32_1 = arith.constant 0 : i32
    return %c0_i32, %c0_i32_0 : i32, i32
  }
  func.func @transform_9(%arg0: i32) -> (i32, i32) {
    %c0_i32 = arith.constant 0 : i32
    %c0_i32_0 = arith.constant 0 : i32
    %c0_i32_1 = arith.constant 0 : i32
    return %c0_i32, %c0_i32_0 : i32, i32
  }
  func.func @transform_10(%arg0: i32) -> (i32, i32, i32) {
    %c0_i32 = arith.constant 0 : i32
    %c0_i32_0 = arith.constant 0 : i32
    %c0_i32_1 = arith.constant 0 : i32
    return %arg0, %c0_i32, %c0_i32_0 : i32, i32, i32
  }
}

</mosaic_0001>

<bundles_post_ra>
// kernel: tile.32
= control target key start
LH: loop header
LB: loop body
LE: loop exit
PB: predicated region body
PF: predicated region fallthrough
CT: control target
= control target key end

     0   :  { %s22_s0 = inlined_call_operand.vmem [shape: f32[32], index: 0, kind: input, shape index: {}]   ;;  %s23_s1 = inlined_call_operand.vmem [shape: f32[8,32], index: 1, kind: output, shape index: {}]  }
   0x1   :  { %v4_v0 = vld [vmem:[%s22_s0] ss:$0 sm:$0xff] }
   0x2   :  { %5 = vst [vmem:[%s23_s1] sm:$0xff] %v4_v0 }

// kernel: tile.33
= control target key start
LH: loop header
LB: loop body
LE: loop exit
PB: predicated region body
PF: predicated region fallthrough
CT: control target
= control target key end

     0   :  { %s7_s6 = smov 3  ;;  %s14_s9 = smov 3  ;;  %vm4_vm0 = vcmask 261120   ;;  %vm11_vm1 = vcmask 1048320   ;;  %vm18_vm2 = vcmask 785920   ;;  %vm25_vm3 = vcmask 523520   ;;  %s76_s0 = inlined_call_operand.vmem [shape: f32[8,32], index: 0, kind: input, shape index: {}]   ;;  %s77_s1 = inlined_call_operand.vmem [shape: f32[1,256], index: 1, kind: output, shape index: {}]  }
   0x1   :  { %v38_v0 = vld [vmem:[%s76_s0 + $0x3] ss:$4 sm:%s7_s6]   ;;  %s45_s10 = smov 96   ;;  %s21_s11 = smov 3  ;;  %v39_v1 = vld [vmem:[%s76_s0 + $0x2] ss:$4 sm:%s14_s9]  }
   0x2   :  { %9 = vrot.lane.b32.xlu0 %v38_v0, %s45_s10  ;;  %v40_v2 = vld [vmem:[%s76_s0 + $0x1] ss:$4 sm:%s21_s11]   ;;  %s2_s16 = smov 3  ;;  %s46_s17 = smov 32  }
   0x3   :  { %23 = vrot.lane.b32.xlu1 %v40_v2, %s46_s17  ;;  %v3_v3 = vld [vmem:[%s76_s0] ss:$4 sm:%s2_s16]   ;;  %s47_s0 = smov 64  }
   0x4   :  { %5 = vst.msk [vmem:[#allocation0] ss:$8 sm:$0x3] %vm4_vm0, %v3_v3  }
   0x6   :  { %16 = vrot.lane.b32.xlu0 %v39_v1, %s47_s0 }
  0x74   :  { %v10_v4 = vpop.permute.xlu0 %9  }
  0x75   :  { %12 = vst.msk [vmem:[#allocation0] ss:$8 sm:$0x3] %vm11_vm1, %v10_v4   ;;  %v24_v5 = vpop.permute.xlu1 %23  }
  0x78   :  { %v17_v6 = vpop.permute.xlu0 %16  }
  0x79   :  { %19 = vst.msk [vmem:[#allocation0] ss:$8 sm:$0x3] %vm18_vm2, %v17_v6  }
  0x7a   :  { %26 = vst.msk [vmem:[#allocation0] ss:$8 sm:$0x3] %vm25_vm3, %v24_v5  }
  0x81   :  { %v30_v7 = vld [vmem:[#allocation0] sm:$0x1]  ;;  %v34_v8 = vld [vmem:[#allocation0 + $0x8] sm:$0x1] }
  0x82   :  { %32 = vst [vmem:[%s77_s1] sm:$0x1] %v30_v7  ;;  %41 = vst [vmem:[%s77_s1 + $0x1] sm:$0x1] %v34_v8 }

// kernel: tile.47
= control target key start
LH: loop header
LB: loop body
LE: loop exit
PB: predicated region body
PF: predicated region fallthrough
CT: control target
= control target key end

     0   :  { %s49_s8 = smov 96   ;;  %vm3_vm0 = vcmask 261120   ;;  %s51_s15 = smov 64   ;;  %vm11_vm1 = vcmask 1048320   ;;  %vm19_vm2 = vcmask 785920   ;;  %vm27_vm3 = vcmask 523520   ;;  %s80_s0 = inlined_call_operand.vmem [shape: f32[2,8,32], index: 0, kind: input, shape index: {}]   ;;  %s81_s1 = inlined_call_operand.vmem [shape: f32[2,256], index: 1, kind: output, shape index: {}]  }
   0x1   :  { %v42_v0 = vld.sshfl [vmem:[%s80_s0 + $0x3] sm:$0xff pattern:$0xccccc480]   ;;  %v43_v1 = vld.sshfl [vmem:[%s80_s0 + $0x2] sm:$0xff pattern:$0xccccc480]  }
   0x2   :  { %9 = vrot.lane.b32.xlu0 %v42_v0, %s49_s8  ;;  %v44_v2 = vld.sshfl [vmem:[%s80_s0 + $0x1] sm:$0xff pattern:$0xccccc480]   ;;  %v2_v3 = vld [vmem:[%s80_s0] ss:$4 sm:$0xf]  }
   0x3   :  { %s50_s0 = smov 32   ;;  %4 = vst.msk [vmem:[#allocation0] ss:$8 sm:$0x3] %vm3_vm0, %v2_v3  }
   0x4   :  { %25 = vrot.lane.b32.xlu1 %v44_v2, %s50_s0  ;;  %6 = vst.msk [vmem:[#allocation0 - $0xf] ss:$8 sm:$0xc] %vm3_vm0, %v2_v3  }
   0x6   :  { %17 = vrot.lane.b32.xlu0 %v43_v1, %s51_s15 }
  0x74   :  { %v10_v4 = vpop.permute.xlu0 %9  }
  0x75   :  { %12 = vst.msk [vmem:[#allocation0] sm:$0x3] %vm11_vm1, %v10_v4   ;;  %14 = vst.msk [vmem:[#allocation0 + $0x6] sm:$0xc] %vm11_vm1, %v10_v4  }
  0x76   :  { %v26_v5 = vpop.permute.xlu1 %25  }
  0x78   :  { %v18_v6 = vpop.permute.xlu0 %17  }
  0x79   :  { %20 = vst.msk [vmem:[#allocation0] sm:$0x3] %vm19_vm2, %v18_v6   ;;  %22 = vst.msk [vmem:[#allocation0 + $0x6] sm:$0xc] %vm19_vm2, %v18_v6  }
  0x7a   :  { %28 = vst.msk [vmem:[#allocation0] sm:$0x3] %vm27_vm3, %v26_v5   ;;  %30 = vst.msk [vmem:[#allocation0 + $0x6] sm:$0xc] %vm27_vm3, %v26_v5  }
  0x81   :  { %v34_v7 = vld [vmem:[#allocation0] sm:$0x3]  ;;  %v38_v8 = vld [vmem:[#allocation0 + $0x8] sm:$0x3] }
  0x82   :  { %36 = vst [vmem:[%s81_s1] sm:$0x3] %v34_v7  ;;  %45 = vst [vmem:[%s81_s1 + $0x2] sm:$0x3] %v38_v8 }

// kernel: senet_block_forward.1
= control target key start
LH: loop header
LB: loop body
LE: loop exit
PB: predicated region body
PF: predicated region fallthrough
CT: control target
= control target key end

     0   :  { %s2666_s13 = smov 0   ;;  %s3366_s0 = inlined_call_operand.vmem [shape: bf16[2,8,128], index: 0, kind: input, shape index: {}]   ;;  %s3367_s1 = inlined_call_operand.vmem [shape: bf16[384,512], index: 1, kind: input, shape index: {}]   ;;  %s3368_s2 = inlined_call_operand.vmem [shape: f32[1,256], index: 2, kind: input, shape index: {}]   ;;  %s3369_s3 = inlined_call_operand.vmem [shape: f32[1,256], index: 3, kind: input, shape index: {}]   ;;  %s3370_s4 = inlined_call_operand.vmem [shape: bf16[768,256], index: 4, kind: input, shape index: {}]   ;;  %s3371_s5 = inlined_call_operand.vmem [shape: f32[1,256], index: 5, kind: input, shape index: {}]   ;;  %s3372_s6 = inlined_call_operand.vmem [shape: f32[2,256], index: 6, kind: input, shape index: {}]   ;;  %s3373_s7 = inlined_call_operand.vmem [shape: f32[2,1], index: 7, kind: input, shape index: {}]   ;;  %s3374_s8 = inlined_call_operand.vmem [shape: f32[2,256], index: 8, kind: input, shape index: {}]   ;;  %s3375_s9 = inlined_call_operand.vmem [shape: f32[1,256], index: 9, kind: input, shape index: {}]   ;;  %s3376_s10 = inlined_call_operand.vmem [shape: f32[2,8,256], index: 10, kind: output, shape index: {}]  }
   0x1 LB: > { %s2075_s14 = sadd.s32 4294967295, %s2606_s13   ;;  %p2079_p0 = scmp.ge.s32.totalorder %s2606_s13, 1  ;;  %s2606_s13 = sphi %s2666_s13, %s20_s13  }
   0x2   : > { %p311_p1 = scmp.lt.s32.totalorder %s2606_s13, 3 }
   0x4   : > { %p312_p2 = pnand %p2079_p0, %p311_p1 }
   0x5   : > { %v2303_v0 = vld [vmem:[%s3367_s1 + $0x4] ss:$16 sps:$4 sm:$0xff] (!%p312_p2)   ;;  %v2305_v1 = vld [vmem:[%s3367_s1] ss:$16 sps:$4 sm:$0xff] (!%p312_p2)   ;;  %v2608_v5 = vmov (!%p312_p2), 0   ;;  %p348_p3 = scmp.lt.s32.totalorder (!%p312_p2), %s2075_s14, 1 }
   0x6   : > { %315 = sbr.rel (%p312_p2) target bundleno = 1035 (0x40b), region = 60  ;;  %957 = vmatprep.subr.bf16.mxu1 (!%p312_p2), %v2303_v0  ;;  %v2306_v2 = vld [vmem:[%s3367_s1 + $0x24] ss:$16 sps:$4 sm:$0xff] (!%p312_p2)   ;;  %v2308_v3 = vld [vmem:[%s3367_s1 + $0x20] ss:$16 sps:$4 sm:$0xff] (!%p312_p2)   ;;  %2302 = vset.pattern.permute.xlu0 (!%p312_p2), %v2608_v5  ;;  %vm370_vm0 = vcmask (!%p312_p2), 1040384  }
   0x7   : > { %958 = vmatpush1.bf16.msra.mxu1 (!%p312_p2), %v2305_v1  ;;  %v2309_v4 = vld [vmem:[%s3367_s1 + $0x44] ss:$16 sps:$4 sm:$0xff] (!%p312_p2)   ;;  %v2311_v6 = vld [vmem:[%s3367_s1 + $0x40] ss:$16 sps:$4 sm:$0xff] (!%p312_p2)   ;;  %vm371_vm1 = vsmask.f32 (!%p312_p2), 256 }
   0x8   : > { %959 = vmatprep.subr.bf16.mxu1 (!%p312_p2), %v2306_v2  ;;  %v2312_v7 = vld [vmem:[%s3367_s1 + $0x64] ss:$16 sps:$4 sm:$0xff] (!%p312_p2)   ;;  %v2314_v8 = vld [vmem:[%s3367_s1 + $0x60] ss:$16 sps:$4 sm:$0xff] (!%p312_p2)   ;;  %vm2797_vm2 = vmand (!%p312_p2), %vm370_vm0, %vm371_vm1  ;;  %vm377_vm3 = vcmask (!%p312_p2), 1043456   ;;  %vm1930_vm6 = vcmask (!%p312_p2), 1041408  }
   0x9   : > { %v2315_v9 = vld [vmem:[%s3367_s1 + $0x84] ss:$16 sps:$4 sm:$0xff] (!%p312_p2)   ;;  %v2317_v10 = vld [vmem:[%s3367_s1 + $0x80] ss:$16 sps:$4 sm:$0xff] (!%p312_p2)   ;;  %vm378_vm4 = vsmask.f32 (!%p312_p2), 3328 }
   0xa   : > { %v2318_v11 = vld [vmem:[%s3367_s1 + $0xa4] ss:$16 sps:$4 sm:$0xff] (!%p312_p2)   ;;  %v2320_v12 = vld [vmem:[%s3367_s1 + $0xa0] ss:$16 sps:$4 sm:$0xff] (!%p312_p2)   ;;  %vm2864_vm5 = vmand (!%p312_p2), %vm377_vm3, %vm378_vm4 }
   0xb   : > { %960 = vmatpush1.bf16.msra.mxu1 (!%p312_p2), %v2308_v3  ;;  %v2321_v13 = vld [vmem:[%s3367_s1 + $0xc4] ss:$16 sps:$4 sm:$0xff] (!%p312_p2)   ;;  %v2323_v15 = vld [vmem:[%s3367_s1 + $0xc0] ss:$16 sps:$4 sm:$0xff] (!%p312_p2)   ;;  %v2523_v3 = vld [vmem:[%s3367_s1 + $0x28] ss:$16 sps:$4 sm:$0xff] (!%p312_p2)  }
   0xc   : > { %961 = vmatprep.subr.bf16.mxu1 (!%p312_p2), %v2309_v4  ;;  %v2324_v16 = vld [vmem:[%s3367_s1 + $0xe4] ss:$16 sps:$4 sm:$0xff] (!%p312_p2)   ;;  %v2326_v17 = vld [vmem:[%s3367_s1 + $0xe0] ss:$16 sps:$4 sm:$0xff] (!%p312_p2)  }
   0xd   : > { %s3382_s14 = smov (!%p348_p3, %s2075_s14), 1  ;;  %v2327_v18 = vld [vmem:[%s3367_s1 + $0x104] ss:$16 sps:$4 sm:$0xff]   ;;  %v2329_v19 = vld [vmem:[%s3367_s1 + $0x100] ss:$16 sps:$4 sm:$0xff]  }
   0xe   : > { %s2080_s17 = sshll.u32 %s3382_s14, 2  ;;  %v2330_v20 = vld [vmem:[%s3367_s1 + $0x124] ss:$16 sps:$4 sm:$0xff]   ;;  %v2378_v22 = vld [vmem:[%s3370_s4] ss:$8 sps:$4 sm:$0xff]   ;;  %s2280_s21 = sshll.u32 %s3382_s14, 4 }
   0xf   : > { %962 = vmatpush1.bf16.msra.mxu1 %v2311_v6  ;;  %s351_s22 = scalar_lea.vmem %s3366_s0, %s2080_s17  ;;  %v2376_v21 = vld [vmem:[%s3370_s4 + $0x4] ss:$8 sps:$4 sm:$0xff]   ;;  %v2332_v23 = vld [vmem:[%s3367_s1 + $0x120] ss:$16 sps:$4 sm:$0xff]   ;;  %v2379_v24 = vld [vmem:[%s3370_s4 + $0x14] ss:$8 sps:$4 sm:$0xff]   ;;  %s356_s24 = scalar_lea.vmem %s3376_s10, %s2280_s21 }
  0x10   : > { %963 = vmatprep.subr.bf16.mxu1 %v2312_v7  ;;  %v2720_v14 = vld [vmem:[%s351_s22] sm:$0xf]  ;;  %1767 = vmatprep.subr.bf16.mxu0 %v2376_v21  ;;  %v2333_v25 = vld [vmem:[%s3367_s1 + $0x144] ss:$16 sps:$4 sm:$0xff]   ;;  %v2381_v26 = vld [vmem:[%s3370_s4 + $0x10] ss:$8 sps:$4 sm:$0xff]  }
  0x11   : > { %989 = vmatprep.mubr.bf16.mxu1 %v2720_v14  ;;  %1768 = vmatpush1.bf16.msra.mxu0 %v2378_v22  ;;  %v2335_v27 = vld [vmem:[%s3367_s1 + $0x140] ss:$16 sps:$4 sm:$0xff]   ;;  %v2382_v28 = vld [vmem:[%s3370_s4 + $0x24] ss:$8 sps:$4 sm:$0xff]   ;;  %v2385_v31 = vld [vmem:[%s3370_s4 + $0x34] ss:$8 sps:$4 sm:$0xff]   ;;  %v2083_v37 = vcombine.low %v2720_v14, %v2720_v14 }
  0x12   : > { %1769 = vmatprep.subr.bf16.mxu0 %v2379_v24  ;;  %v2336_v29 = vld [vmem:[%s3367_s1 + $0x164] ss:$16 sps:$4 sm:$0xff]   ;;  %v2384_v30 = vld [vmem:[%s3370_s4 + $0x20] ss:$8 sps:$4 sm:$0xff]   ;;  %v2387_v34 = vld [vmem:[%s3370_s4 + $0x30] ss:$8 sps:$4 sm:$0xff]  }
  0x13   : > { %964 = vmatpush1.bf16.msra.mxu1 %v2314_v8  ;;  %v2338_v32 = vld [vmem:[%s3367_s1 + $0x160] ss:$16 sps:$4 sm:$0xff]   ;;  %v2339_v33 = vld [vmem:[%s3367_s1 + $0x184] ss:$16 sps:$4 sm:$0xff]   ;;  %v363_v40 = vshrl.u32 %v2083_v37, 16  ;;  %v366_v45 = vshll.u32 %v2083_v37, 16 }
  0x14   : > { %965 = vmatprep.subr.bf16.mxu1 %v2315_v9  ;;  %v2341_v35 = vld [vmem:[%s3367_s1 + $0x180] ss:$16 sps:$4 sm:$0xff]   ;;  %v2342_v36 = vld [vmem:[%s3367_s1 + $0x1a4] ss:$16 sps:$4 sm:$0xff]  }
  0x15   : > { %1770 = vmatpush1.bf16.msra.mxu0 %v2381_v26  ;;  %v2344_v38 = vld [vmem:[%s3367_s1 + $0x1a0] ss:$16 sps:$4 sm:$0xff]   ;;  %v2345_v39 = vld [vmem:[%s3367_s1 + $0x1c4] ss:$16 sps:$4 sm:$0xff]   ;;  %v365_v44 = vrot.slane %v363_v40, 7  ;;  %v374_v63 = vrot.slane %v366_v45, 1 }
  0x16   : > { %1771 = vmatprep.subr.bf16.mxu0 %v2382_v28  ;;  %v2347_v42 = vld [vmem:[%s3367_s1 + $0x1c0] ss:$16 sps:$4 sm:$0xff]   ;;  %v2348_v43 = vld [vmem:[%s3367_s1 + $0x1e4] ss:$16 sps:$4 sm:$0xff]  }
  0x17   : > { %966 = vmatpush1.bf16.msra.mxu1 %v2317_v10  ;;  %v2350_v46 = vld [vmem:[%s3367_s1 + $0x1e0] ss:$16 sps:$4 sm:$0xff]   ;;  %v2354_v47 = vld [vmem:[%s3367_s1 + $0x204] ss:$16 sps:$4 sm:$0xff]   ;;  %v368_v48 = vor.u32 %v366_v45, %v365_v44  ;;  %v375_v2 = vor.u32 %v374_v63, %v363_v40 }
  0x18   : > { %967 = vmatprep.subr.bf16.mxu1 %v2318_v11  ;;  %v2352_v49 = vld [vmem:[%s3367_s1 + $0x200] ss:$16 sps:$4 sm:$0xff]   ;;  %v2357_v50 = vld [vmem:[%s3367_s1 + $0x224] ss:$16 sps:$4 sm:$0xff]  }
  0x19   : > { %1772 = vmatpush1.bf16.msra.mxu0 %v2384_v30  ;;  %v2821_v51 = vsel %vm2797_vm2, 0, %v368_v48  ;;  %v2355_v52 = vld [vmem:[%s3367_s1 + $0x220] ss:$16 sps:$4 sm:$0xff]   ;;  %v2360_v53 = vld [vmem:[%s3367_s1 + $0x244] ss:$16 sps:$4 sm:$0xff]   ;;  %v2870_v4 = vsel %vm2864_vm5, %v375_v2, 0 }
  0x1a   : > { %1773 = vmatprep.subr.bf16.mxu0 %v2385_v31  ;;  %v2358_v54 = vld [vmem:[%s3367_s1 + $0x240] ss:$16 sps:$4 sm:$0xff]   ;;  %v2363_v55 = vld [vmem:[%s3367_s1 + $0x264] ss:$16 sps:$4 sm:$0xff]  }
  0x1b   : > { %968 = vmatpush1.bf16.msra.mxu1 %v2320_v12  ;;  %v2361_v56 = vld [vmem:[%s3367_s1 + $0x260] ss:$16 sps:$4 sm:$0xff]   ;;  %v2366_v57 = vld [vmem:[%s3367_s1 + $0x284] ss:$16 sps:$4 sm:$0xff]  }
  0x1c   : > { %969 = vmatprep.subr.bf16.mxu1 %v2321_v13  ;;  %v2364_v58 = vld [vmem:[%s3367_s1 + $0x280] ss:$16 sps:$4 sm:$0xff]   ;;  %v2369_v59 = vld [vmem:[%s3367_s1 + $0x2a4] ss:$16 sps:$4 sm:$0xff]  }
  0x1d   : > { %1774 = vmatpush1.bf16.msra.mxu0 %v2387_v34  ;;  %v2367_v60 = vld [vmem:[%s3367_s1 + $0x2a0] ss:$16 sps:$4 sm:$0xff]   ;;  %v2372_v61 = vld [vmem:[%s3367_s1 + $0x2c4] ss:$16 sps:$4 sm:$0xff]  }
  0x1e   : > { %v2370_v62 = vld [vmem:[%s3367_s1 + $0x2c0] ss:$16 sps:$4 sm:$0xff]   ;;  %v2375_v0 = vld [vmem:[%s3367_s1 + $0x2e4] ss:$16 sps:$4 sm:$0xff]  }
  0x1f   : > { %970 = vmatpush1.bf16.msra.mxu1 %v2323_v15  ;;  %v2373_v1 = vld [vmem:[%s3367_s1 + $0x2e0] ss:$16 sps:$4 sm:$0xff]   ;;  %v2388_v6 = vld [vmem:[%s3370_s4 + $0x44] ss:$8 sps:$4 sm:$0xff]   ;;  %v2391_v8 = vld [vmem:[%s3370_s4 + $0x54] ss:$8 sps:$4 sm:$0xff]  }
  0x20   : > { %971 = vmatprep.subr.bf16.mxu1 %v2324_v16  ;;  %v2390_v7 = vld [vmem:[%s3370_s4 + $0x40] ss:$8 sps:$4 sm:$0xff]   ;;  %1775 = vmatprep.subr.bf16.mxu0 %v2388_v6  ;;  %v2393_v9 = vld [vmem:[%s3370_s4 + $0x50] ss:$8 sps:$4 sm:$0xff]   ;;  %v2394_v10 = vld [vmem:[%s3370_s4 + $0x64] ss:$8 sps:$4 sm:$0xff]  }
  0x21   : > { %1776 = vmatpush1.bf16.msra.mxu0 %v2390_v7  ;;  %v2396_v11 = vld [vmem:[%s3370_s4 + $0x60] ss:$8 sps:$4 sm:$0xff]   ;;  %v2397_v12 = vld [vmem:[%s3370_s4 + $0x74] ss:$8 sps:$4 sm:$0xff]   ;;  %v2399_v13 = vld [vmem:[%s3370_s4 + $0x70] ss:$8 sps:$4 sm:$0xff]  }
  0x22   : > { %1777 = vmatprep.subr.bf16.mxu0 %v2391_v8  ;;  %v2402_v15 = vld [vmem:[%s3370_s4 + $0x80] ss:$8 sps:$4 sm:$0xff]   ;;  %v2403_v16 = vld [vmem:[%s3370_s4 + $0x94] ss:$8 sps:$4 sm:$0xff]   ;;  %v2411_v21 = vld [vmem:[%s3370_s4 + $0xb0] ss:$8 sps:$4 sm:$0xff]  }
  0x23   : > { %972 = vmatpush1.bf16.msra.mxu1 %v2326_v17  ;;  %v2405_v17 = vld [vmem:[%s3370_s4 + $0x90] ss:$8 sps:$4 sm:$0xff]   ;;  %v2412_v22 = vld [vmem:[%s3370_s4 + $0xc4] ss:$8 sps:$4 sm:$0xff]   ;;  %v2415_v24 = vld [vmem:[%s3370_s4 + $0xd4] ss:$8 sps:$4 sm:$0xff]  }
  0x24   : > { %973 = vmatprep.subr.bf16.mxu1 %v2327_v18  ;;  %v2406_v18 = vld [vmem:[%s3370_s4 + $0xa4] ss:$8 sps:$4 sm:$0xff]   ;;  %v2421_v28 = vld [vmem:[%s3370_s4 + $0xf4] ss:$8 sps:$4 sm:$0xff]   ;;  %v2424_v7 = vld [vmem:[%s3370_s4 + $0x100] ss:$8 sps:$4 sm:$0xff]  }
  0x25   : > { %1778 = vmatpush1.bf16.msra.mxu0 %v2393_v9  ;;  %v2418_v26 = vld [vmem:[%s3370_s4 + $0xe4] ss:$8 sps:$4 sm:$0xff]   ;;  %v2429_v9 = vld [vmem:[%s3370_s4 + $0x114] ss:$8 sps:$4 sm:$0xff]  }
  0x26   : > { %1779 = vmatprep.subr.bf16.mxu0 %v2394_v10  ;;  %v2426_v30 = vld [vmem:[%s3370_s4 + $0x104] ss:$8 sps:$4 sm:$0xff]   ;;  %v2435_v41 = vld [vmem:[%s3370_s4 + $0x134] ss:$8 sps:$4 sm:$0xff]  }
  0x27   : > { %974 = vmatpush1.bf16.msra.mxu1 %v2329_v19  ;;  %v2408_v19 = vld [vmem:[%s3370_s4 + $0xa0] ss:$8 sps:$4 sm:$0xff]  }
  0x28   : > { %975 = vmatprep.subr.bf16.mxu1 %v2330_v20  ;;  %v2409_v20 = vld [vmem:[%s3370_s4 + $0xb4] ss:$8 sps:$4 sm:$0xff]  }
  0x29   : > { %1780 = vmatpush1.bf16.msra.mxu0 %v2396_v11  ;;  %v2427_v11 = vld [vmem:[%s3370_s4 + $0x110] ss:$8 sps:$4 sm:$0xff]  }
  0x2a   : > { %1781 = vmatprep.subr.bf16.mxu0 %v2397_v12  ;;  %v2432_v12 = vld [vmem:[%s3370_s4 + $0x124] ss:$8 sps:$4 sm:$0xff]  }
  0x2b   : > { %976 = vmatpush1.bf16.msra.mxu1 %v2332_v23  ;;  %v2414_v23 = vld [vmem:[%s3370_s4 + $0xc0] ss:$8 sps:$4 sm:$0xff]  }
  0x2c   : > { %977 = vmatprep.subr.bf16.mxu1 %v2333_v25  ;;  %v2417_v25 = vld [vmem:[%s3370_s4 + $0xd0] ss:$8 sps:$4 sm:$0xff]  }
  0x2d   : > { %1782 = vmatpush1.bf16.msra.mxu0 %v2399_v13  ;;  %v2430_v13 = vld [vmem:[%s3370_s4 + $0x120] ss:$8 sps:$4 sm:$0xff]  }
  0x2f   : > { %978 = vmatpush1.bf16.msra.mxu1 %v2335_v27  ;;  %v2420_v27 = vld [vmem:[%s3370_s4 + $0xe0] ss:$8 sps:$4 sm:$0xff]  }
  0x30   : > { %979 = vmatprep.subr.bf16.mxu1 %v2336_v29  ;;  %v2423_v29 = vld [vmem:[%s3370_s4 + $0xf0] ss:$8 sps:$4 sm:$0xff]  }
  0x33   : > { %980 = vmatpush1.bf16.msra.mxu1 %v2338_v32 }
  0x34   : > { %981 = vmatprep.subr.bf16.mxu1 %v2339_v33 }
  0x37   : > { %982 = vmatpush1.bf16.msra.mxu1 %v2341_v35  ;;  %v1123_v35 = vlaneseq }
  0x38   : > { %983 = vmatprep.subr.bf16.mxu1 %v2342_v36 }
  0x39   : > { %v2949_v36 = vshrl.u32 %v1123_v35, 7  ;;  %v2468_v35 = vld [vmem:[%s3370_s4 + $0x1e4] ss:$8 sps:$4 sm:$0xff]  }
  0x3b   : > { %984 = vmatpush1.bf16.msra.mxu1 %v2344_v38  ;;  %v2952_v37 = vsub.s32 0, %v2949_v36  ;;  %v1121_v38 = vld [vmem:[%s3368_s2] sm:$0x3] }
  0x3c   : > { %985 = vmatprep.subr.bf16.mxu1 %v2345_v39  ;;  %v2958_v39 = vsub.s32 1, %v2949_v36 }
  0x3d   : > { %v1126_v40 = vrot.slane %v1121_v38, %v2952_v37 }
  0x3f   : > { %986 = vmatpush1.bf16.msra.mxu1 %v2347_v42 }
  0x40   : > { %987 = vmatprep.subr.bf16.mxu1 %v2348_v43  ;;  %v1130_v43 = vrot.slane %v1121_v38, %v2958_v39  ;;  %v2466_v38 = vld [vmem:[%s3370_s4 + $0x1e0] ss:$8 sps:$4 sm:$0xff]  }
  0x43   : > { %988 = vmatpush1.bf16.msra.mxu1 %v2350_v46 }
  0x44   : > { %998 = vmatprep.subr.bf16.mxu1 %v2354_v47 }
  0x46   : > { %990 = vmatmul.mubr.bf16.vlgmr.msra.gmra.mrb[0].mxu1 %v2821_v51 }
  0x47   : > { %999 = vmatpush1.bf16.msra.mxu1 %v2352_v49  ;;  %1030 = vmatprep.mubr.bf16.mxu1 %v2608_v5 }
  0x48   : > { %1000 = vmatprep.subr.bf16.mxu1 %v2357_v50 }
  0x4b   : > { %1001 = vmatpush1.bf16.msra.mxu1 %v2355_v52 }
  0x4c   : > { %1002 = vmatprep.subr.bf16.mxu1 %v2360_v53 }
  0x4f   : > { %1003 = vmatpush1.bf16.msra.mxu1 %v2358_v54 }
  0x50   : > { %1004 = vmatprep.subr.bf16.mxu1 %v2363_v55 }
  0x53   : > { %1005 = vmatpush1.bf16.msra.mxu1 %v2361_v56 }
  0x54   : > { %1006 = vmatprep.subr.bf16.mxu1 %v2366_v57 }
  0x57   : > { %1007 = vmatpush1.bf16.msra.mxu1 %v2364_v58 }
  0x58   : > { %1008 = vmatprep.subr.bf16.mxu1 %v2369_v59 }
  0x5b   : > { %1009 = vmatpush1.bf16.msra.mxu1 %v2367_v60 }
  0x5c   : > { %1010 = vmatprep.subr.bf16.mxu1 %v2372_v61 }
  0x5f   : > { %1011 = vmatpush1.bf16.msra.mxu1 %v2370_v62 }
  0x60   : > { %1012 = vmatprep.subr.bf16.mxu1 %v2375_v0 }
  0x63   : > { %1013 = vmatpush1.bf16.msra.mxu1 %v2373_v1 }
  0x66   : > { %1031 = vmatmul.mubr.bf16.vlgmr.msra.gmra.mrb[4].mxu1 %v2870_v4 }
  0x67   : > { %1071 = vmatprep.mubr.bf16.mxu1 %v2720_v14  ;;  %v2400_v14 = vld [vmem:[%s3370_s4 + $0x84] ss:$8 sps:$4 sm:$0xff]  }
  0x68   : > { %1783 = vmatprep.subr.bf16.mxu0 %v2400_v14  ;;  %v2433_v14 = vld [vmem:[%s3370_s4 + $0x130] ss:$8 sps:$4 sm:$0xff]  }
  0x69   : > { %1784 = vmatpush1.bf16.msra.mxu0 %v2402_v15  ;;  %v2438_v15 = vld [vmem:[%s3370_s4 + $0x144] ss:$8 sps:$4 sm:$0xff]  }
  0x6a   : > { %1785 = vmatprep.subr.bf16.mxu0 %v2403_v16  ;;  %v2436_v16 = vld [vmem:[%s3370_s4 + $0x140] ss:$8 sps:$4 sm:$0xff]  }
  0x6d   : > { %1786 = vmatpush1.bf16.msra.mxu0 %v2405_v17  ;;  %v2441_v17 = vld [vmem:[%s3370_s4 + $0x154] ss:$8 sps:$4 sm:$0xff]  }
  0x6e   : > { %1787 = vmatprep.subr.bf16.mxu0 %v2406_v18  ;;  %v2439_v18 = vld [vmem:[%s3370_s4 + $0x150] ss:$8 sps:$4 sm:$0xff]  }
  0x71   : > { %1788 = vmatpush1.bf16.msra.mxu0 %v2408_v19  ;;  %v2444_v19 = vld [vmem:[%s3370_s4 + $0x164] ss:$8 sps:$4 sm:$0xff]  }
  0x72   : > { %1789 = vmatprep.subr.bf16.mxu0 %v2409_v20  ;;  %v2442_v20 = vld [vmem:[%s3370_s4 + $0x160] ss:$8 sps:$4 sm:$0xff]  }
  0x75   : > { %1790 = vmatpush1.bf16.msra.mxu0 %v2411_v21  ;;  %v2447_v21 = vld [vmem:[%s3370_s4 + $0x174] ss:$8 sps:$4 sm:$0xff]  }
  0x76   : > { %1791 = vmatprep.subr.bf16.mxu0 %v2412_v22  ;;  %v2445_v22 = vld [vmem:[%s3370_s4 + $0x170] ss:$8 sps:$4 sm:$0xff]  }
  0x79   : > { %1792 = vmatpush1.bf16.msra.mxu0 %v2414_v23  ;;  %v2450_v23 = vld [vmem:[%s3370_s4 + $0x184] ss:$8 sps:$4 sm:$0xff]  }
  0x7a   : > { %1793 = vmatprep.subr.bf16.mxu0 %v2415_v24  ;;  %v2448_v24 = vld [vmem:[%s3370_s4 + $0x180] ss:$8 sps:$4 sm:$0xff]  }
  0x7d   : > { %1794 = vmatpush1.bf16.msra.mxu0 %v2417_v25  ;;  %v2453_v25 = vld [vmem:[%s3370_s4 + $0x194] ss:$8 sps:$4 sm:$0xff]  }
  0x7e   : > { %1795 = vmatprep.subr.bf16.mxu0 %v2418_v26  ;;  %v2451_v26 = vld [vmem:[%s3370_s4 + $0x190] ss:$8 sps:$4 sm:$0xff]  }
  0x81   : > { %1796 = vmatpush1.bf16.msra.mxu0 %v2420_v27  ;;  %v2456_v27 = vld [vmem:[%s3370_s4 + $0x1a4] ss:$8 sps:$4 sm:$0xff]  }
  0x82   : > { %1797 = vmatprep.subr.bf16.mxu0 %v2421_v28  ;;  %v2454_v28 = vld [vmem:[%s3370_s4 + $0x1a0] ss:$8 sps:$4 sm:$0xff]  }
  0x85   : > { %1798 = vmatpush1.bf16.msra.mxu0 %v2423_v29  ;;  %v2459_v29 = vld [vmem:[%s3370_s4 + $0x1b4] ss:$8 sps:$4 sm:$0xff]  }
  0x86   : > { %1808 = vmatprep.subr.bf16.mxu0 %v2426_v30  ;;  %v2457_v30 = vld [vmem:[%s3370_s4 + $0x1b0] ss:$8 sps:$4 sm:$0xff]  }
 0x119   : > { %v991_v31 = vpop.f32.mrb[0].mxu1 }
 0x11a   : > { %v993_v32 = vpop.f32.mrb[1].mxu1 }
 0x11b   : > { %v995_v33 = vpop.f32.mrb[2].mxu1 }
 0x11c   : > { %v996_v34 = vpop.f32.mrb[3].mxu1  ;;  %v2465_v33 = vld [vmem:[%s3370_s4 + $0x1d4] ss:$8 sps:$4 sm:$0xff]  }
 0x11d   : > { %v2463_v34 = vld [vmem:[%s3370_s4 + $0x1d0] ss:$8 sps:$4 sm:$0xff]  }
 0x139   : > { %v1032_v42 = vpop.f32.mrb[4].mxu1 }
 0x13a   : > { %v1033_v44 = vadd.f32 %v1032_v42, %v991_v31  ;;  %v1034_v45 = vpop.f32.mrb[5].mxu1  ;;  %v2462_v31 = vld [vmem:[%s3370_s4 + $0x1c4] ss:$8 sps:$4 sm:$0xff]   ;;  %v2469_v42 = vld [vmem:[%s3370_s4 + $0x1f0] ss:$8 sps:$4 sm:$0xff]  }
 0x13b   : > { %v1035_v46 = vadd.f32 %v1034_v45, %v993_v32  ;;  %v1036_v47 = vpop.f32.mrb[6].mxu1  ;;  %v2460_v32 = vld [vmem:[%s3370_s4 + $0x1c0] ss:$8 sps:$4 sm:$0xff]   ;;  %v2477_v45 = vld [vmem:[%s3370_s4 + $0x214] ss:$8 sps:$4 sm:$0xff]  }
 0x13c   : > { %v1133_v48 = vadd.f32 %v1126_v40, %v1033_v44  ;;  %v1037_v49 = vpop.f32.mrb[7].mxu1  ;;  %v2471_v40 = vld [vmem:[%s3370_s4 + $0x1f4] ss:$8 sps:$4 sm:$0xff]   ;;  %v2472_v44 = vld [vmem:[%s3370_s4 + $0x200] ss:$8 sps:$4 sm:$0xff]  }
 0x13d   : > { %v1134_v50 = vadd.f32 %v1130_v43, %v1035_v46  ;;  %v2474_v43 = vld [vmem:[%s3370_s4 + $0x204] ss:$8 sps:$4 sm:$0xff]   ;;  %v2475_v47 = vld [vmem:[%s3370_s4 + $0x210] ss:$8 sps:$4 sm:$0xff]   ;;  %v2478_v49 = vld [vmem:[%s3370_s4 + $0x220] ss:$8 sps:$4 sm:$0xff]  }
 0x13e   : > { %v1135_v52 = vmax.f32 %v1133_v48, 0.0  ;;  %v2480_v48 = vld [vmem:[%s3370_s4 + $0x224] ss:$8 sps:$4 sm:$0xff]  }
 0x13f   : > { %v1136_v53 = vmax.f32 %v1134_v50, 0.0  ;;  %v2483_v50 = vld [vmem:[%s3370_s4 + $0x234] ss:$8 sps:$4 sm:$0xff]  }
 0x140   : > { %v2962_v54 = vpack.c.bf16 %v1135_v52, %v1135_v52  ;;  %v2481_v52 = vld [vmem:[%s3370_s4 + $0x230] ss:$8 sps:$4 sm:$0xff]  }
 0x141   : > { %v1152_v55 = vpack.c.bf16 %v1136_v53, %v1136_v53  ;;  %v2486_v53 = vld [vmem:[%s3370_s4 + $0x244] ss:$8 sps:$4 sm:$0xff]  }
 0x142   : > { %v1154_v56 = vshrl.u32 %v2962_v54, 16  ;;  %v1157_v57 = vshll.u32 %v2962_v54, 16 }
 0x143   : > { %v1161_v58 = vshrl.u32 %v1152_v55, 16  ;;  %v1164_v59 = vshll.u32 %v1152_v55, 16 }
 0x144   : > { %v1156_v60 = vrot.slane %v1154_v56, 7  ;;  %v1171_v61 = vrot.slane %v1157_v57, 1 }
 0x145   : > { %v1163_v62 = vrot.slane %v1161_v58, 7  ;;  %v1173_v63 = vrot.slane %v1164_v59, 1 }
 0x146   : > { %v1159_v0 = vor.u32 %v1157_v57, %v1156_v60  ;;  %v2966_v1 = vor.u32 %v1171_v61, %v1154_v56  ;;  %v2487_v56 = vld [vmem:[%s3370_s4 + $0x250] ss:$8 sps:$4 sm:$0xff]   ;;  %v2492_v57 = vld [vmem:[%s3370_s4 + $0x264] ss:$8 sps:$4 sm:$0xff]  }
 0x147   : > { %v1166_v2 = vor.u32 %v1164_v59, %v1163_v62  ;;  %v2968_v6 = vor.u32 %v1173_v63, %v1161_v58  ;;  %v2490_v58 = vld [vmem:[%s3370_s4 + $0x260] ss:$8 sps:$4 sm:$0xff]   ;;  %v2495_v59 = vld [vmem:[%s3370_s4 + $0x274] ss:$8 sps:$4 sm:$0xff]   ;;  %v2493_v60 = vld [vmem:[%s3370_s4 + $0x270] ss:$8 sps:$4 sm:$0xff]  }
 0x148   : > { %v1169_v10 = vsel %vm2797_vm2, 0, %v1159_v0  ;;  %v2498_v61 = vld [vmem:[%s3370_s4 + $0x284] ss:$8 sps:$4 sm:$0xff]   ;;  %v2496_v62 = vld [vmem:[%s3370_s4 + $0x280] ss:$8 sps:$4 sm:$0xff]  }
 0x149   : > { %v1170_v8 = vsel %vm2797_vm2, 0, %v1166_v2  ;;  %v1178_v46 = vsel %vm2864_vm5, %v2968_v6, 0  ;;  %v2501_v63 = vld [vmem:[%s3370_s4 + $0x294] ss:$8 sps:$4 sm:$0xff]   ;;  %v2499_v0 = vld [vmem:[%s3370_s4 + $0x290] ss:$8 sps:$4 sm:$0xff]  }
 0x14a   : > { %1799 = vmatprep.mubr.bf16.mxu0 %v1170_v8  ;;  %v2504_v2 = vld [vmem:[%s3370_s4 + $0x2a4] ss:$8 sps:$4 sm:$0xff]   ;;  %v2502_v6 = vld [vmem:[%s3370_s4 + $0x2a0] ss:$8 sps:$4 sm:$0xff]   ;;  %v2505_v8 = vld [vmem:[%s3370_s4 + $0x2b0] ss:$8 sps:$4 sm:$0xff]  }
 0x14b   : > { %1800 = vmatmul.mubr.bf16.vlgmr.msra.gmra.mrb[0].mxu0 %v1169_v10  ;;  %v2508_v10 = vld [vmem:[%s3370_s4 + $0x2c0] ss:$8 sps:$4 sm:$0xff]  }
 0x14c   : > { %1809 = vmatpush1.bf16.msra.mxu0 %v2424_v7  ;;  %1840 = vmatprep.mubr.bf16.mxu0 %v1152_v55  ;;  %v2489_v55 = vld [vmem:[%s3370_s4 + $0x254] ss:$8 sps:$4 sm:$0xff]  }
 0x14d   : > { %1810 = vmatprep.subr.bf16.mxu0 %v2429_v9  ;;  %v2507_v7 = vld [vmem:[%s3370_s4 + $0x2b4] ss:$8 sps:$4 sm:$0xff]   ;;  %v2510_v9 = vld [vmem:[%s3370_s4 + $0x2c4] ss:$8 sps:$4 sm:$0xff]  }
 0x150   : > { %1811 = vmatpush1.bf16.msra.mxu0 %v2427_v11  ;;  %v2513_v11 = vld [vmem:[%s3370_s4 + $0x2d4] ss:$8 sps:$4 sm:$0xff]  }
 0x151   : > { %1812 = vmatprep.subr.bf16.mxu0 %v2432_v12  ;;  %v2511_v12 = vld [vmem:[%s3370_s4 + $0x2d0] ss:$8 sps:$4 sm:$0xff]  }
 0x154   : > { %1813 = vmatpush1.bf16.msra.mxu0 %v2430_v13  ;;  %v2516_v13 = vld [vmem:[%s3370_s4 + $0x2e4] ss:$8 sps:$4 sm:$0xff]  }
 0x155   : > { %1814 = vmatprep.subr.bf16.mxu0 %v2435_v41  ;;  %v2514_v41 = vld [vmem:[%s3370_s4 + $0x2e0] ss:$8 sps:$4 sm:$0xff]  }
 0x158   : > { %1815 = vmatpush1.bf16.msra.mxu0 %v2433_v14  ;;  %v2519_v14 = vld [vmem:[%s3370_s4 + $0x2f4] ss:$8 sps:$4 sm:$0xff]  }
 0x159   : > { %1816 = vmatprep.subr.bf16.mxu0 %v2438_v15  ;;  %v2517_v15 = vld [vmem:[%s3370_s4 + $0x2f0] ss:$8 sps:$4 sm:$0xff]  }
 0x15c   : > { %1817 = vmatpush1.bf16.msra.mxu0 %v2436_v16  ;;  %v1177_v16 = vsel %vm2864_vm5, %v2966_v1, 0  ;;  %v2528_v1 = vld [vmem:[%s3367_s1 + $0x4c] ss:$16 sps:$4 sm:$0xff]  }
 0x15d   : > { %1818 = vmatprep.subr.bf16.mxu0 %v2441_v17  ;;  %v2522_v17 = vld [vmem:[%s3367_s1 + $0xc] ss:$16 sps:$4 sm:$0xff]  }
 0x15e   : > { %1039 = vmatprep.subr.bf16.mxu1 %v2522_v17 }
 0x160   : > { %1819 = vmatpush1.bf16.msra.mxu0 %v2439_v18  ;;  %v2520_v18 = vld [vmem:[%s3367_s1 + $0x8] ss:$16 sps:$4 sm:$0xff]  }
 0x161   : > { %1820 = vmatprep.subr.bf16.mxu0 %v2444_v19  ;;  %1040 = vmatpush1.bf16.msra.mxu1 %v2520_v18  ;;  %v2525_v19 = vld [vmem:[%s3367_s1 + $0x2c] ss:$16 sps:$4 sm:$0xff]  }
 0x162   : > { %1041 = vmatprep.subr.bf16.mxu1 %v2525_v19 }
 0x164   : > { %1821 = vmatpush1.bf16.msra.mxu0 %v2442_v20  ;;  %v2526_v20 = vld [vmem:[%s3367_s1 + $0x48] ss:$16 sps:$4 sm:$0xff]  }
 0x165   : > { %1822 = vmatprep.subr.bf16.mxu0 %v2447_v21  ;;  %1042 = vmatpush1.bf16.msra.mxu1 %v2523_v3  ;;  %v2531_v21 = vld [vmem:[%s3367_s1 + $0x6c] ss:$16 sps:$4 sm:$0xff]  }
 0x166   : > { %1043 = vmatprep.subr.bf16.mxu1 %v2528_v1  ;;  %v2609_v1 = vmov 1983009808  }
 0x168   : > { %1823 = vmatpush1.bf16.msra.mxu0 %v2445_v22  ;;  %v2529_v22 = vld [vmem:[%s3367_s1 + $0x68] ss:$16 sps:$4 sm:$0xff]  }
 0x169   : > { %1824 = vmatprep.subr.bf16.mxu0 %v2450_v23  ;;  %1044 = vmatpush1.bf16.msra.mxu1 %v2526_v20  ;;  %v2534_v23 = vld [vmem:[%s3367_s1 + $0x8c] ss:$16 sps:$4 sm:$0xff]   ;;  %v1911_v20 = vunpack.c.l.s4 %v2609_v1 }
 0x16a   : > { %1045 = vmatprep.subr.bf16.mxu1 %v2531_v21 }
 0x16c   : > { %1825 = vmatpush1.bf16.msra.mxu0 %v2448_v24  ;;  %v2532_v24 = vld [vmem:[%s3367_s1 + $0x88] ss:$16 sps:$4 sm:$0xff]  }
 0x16d   : > { %1826 = vmatprep.subr.bf16.mxu0 %v2453_v25  ;;  %1046 = vmatpush1.bf16.msra.mxu1 %v2529_v22  ;;  %v2535_v25 = vld [vmem:[%s3367_s1 + $0xa8] ss:$16 sps:$4 sm:$0xff]  }
 0x16e   : > { %1047 = vmatprep.subr.bf16.mxu1 %v2534_v23 }
 0x170   : > { %1827 = vmatpush1.bf16.msra.mxu0 %v2451_v26  ;;  %v2537_v26 = vld [vmem:[%s3367_s1 + $0xac] ss:$16 sps:$4 sm:$0xff]  }
 0x171   : > { %1828 = vmatprep.subr.bf16.mxu0 %v2456_v27  ;;  %1048 = vmatpush1.bf16.msra.mxu1 %v2532_v24  ;;  %v2540_v27 = vld [vmem:[%s3367_s1 + $0xcc] ss:$16 sps:$4 sm:$0xff]  }
 0x172   : > { %1049 = vmatprep.subr.bf16.mxu1 %v2537_v26 }
 0x174   : > { %1829 = vmatpush1.bf16.msra.mxu0 %v2454_v28  ;;  %v2538_v28 = vld [vmem:[%s3367_s1 + $0xc8] ss:$16 sps:$4 sm:$0xff]  }
 0x175   : > { %1830 = vmatprep.subr.bf16.mxu0 %v2459_v29  ;;  %1050 = vmatpush1.bf16.msra.mxu1 %v2535_v25  ;;  %v2543_v29 = vld [vmem:[%s3367_s1 + $0xec] ss:$16 sps:$4 sm:$0xff]   ;;  %v1912_v25 = vunpack.c.0.s8 %v1911_v20 }
 0x176   : > { %1051 = vmatprep.subr.bf16.mxu1 %v2540_v27 }
 0x178   : > { %1831 = vmatpush1.bf16.msra.mxu0 %v2457_v30  ;;  %v2541_v30 = vld [vmem:[%s3367_s1 + $0xe8] ss:$16 sps:$4 sm:$0xff]  }
 0x179   : > { %1832 = vmatprep.subr.bf16.mxu0 %v2462_v31  ;;  %1052 = vmatpush1.bf16.msra.mxu1 %v2538_v28  ;;  %v2546_v31 = vld [vmem:[%s3367_s1 + $0x10c] ss:$16 sps:$4 sm:$0xff]  }
 0x17a   : > { %1053 = vmatprep.subr.bf16.mxu1 %v2543_v29 }
 0x17c   : > { %1833 = vmatpush1.bf16.msra.mxu0 %v2460_v32  ;;  %v2544_v32 = vld [vmem:[%s3367_s1 + $0x108] ss:$16 sps:$4 sm:$0xff]  }
 0x17d   : > { %1834 = vmatprep.subr.bf16.mxu0 %v2465_v33  ;;  %1054 = vmatpush1.bf16.msra.mxu1 %v2541_v30  ;;  %v2549_v33 = vld [vmem:[%s3367_s1 + $0x12c] ss:$16 sps:$4 sm:$0xff]   ;;  %v1915_v30 = vsub.s32 %v1912_v25, %v2949_v36 }
 0x17e   : > { %1055 = vmatprep.subr.bf16.mxu1 %v2546_v31 }
 0x180   : > { %1835 = vmatpush1.bf16.msra.mxu0 %v2463_v34  ;;  %v2547_v34 = vld [vmem:[%s3367_s1 + $0x128] ss:$16 sps:$4 sm:$0xff]  }
 0x181   : > { %1836 = vmatprep.subr.bf16.mxu0 %v2468_v35  ;;  %1056 = vmatpush1.bf16.msra.mxu1 %v2544_v32  ;;  %v2552_v35 = vld [vmem:[%s3367_s1 + $0x14c] ss:$16 sps:$4 sm:$0xff]   ;;  %v1906_v32 = vld [vmem:[%s3372_s6] sm:$0xf] }
 0x182   : > { %1057 = vmatprep.subr.bf16.mxu1 %v2549_v33 }
 0x184   : > { %1837 = vmatpush1.bf16.msra.mxu0 %v2466_v38  ;;  %v2550_v38 = vld [vmem:[%s3367_s1 + $0x148] ss:$16 sps:$4 sm:$0xff]  }
 0x185   : > { %1838 = vmatprep.subr.bf16.mxu0 %v2471_v40  ;;  %1058 = vmatpush1.bf16.msra.mxu1 %v2547_v34  ;;  %v2555_v40 = vld [vmem:[%s3367_s1 + $0x16c] ss:$16 sps:$4 sm:$0xff]  }
 0x186   : > { %1059 = vmatprep.subr.bf16.mxu1 %v2552_v35 }
 0x188   : > { %1839 = vmatpush1.bf16.msra.mxu0 %v2469_v42  ;;  %v2553_v42 = vld [vmem:[%s3367_s1 + $0x168] ss:$16 sps:$4 sm:$0xff]  }
 0x189   : > { %1849 = vmatprep.subr.bf16.mxu0 %v2474_v43  ;;  %1060 = vmatpush1.bf16.msra.mxu1 %v2550_v38  ;;  %v2558_v43 = vld [vmem:[%s3367_s1 + $0x18c] ss:$16 sps:$4 sm:$0xff]  }
 0x18a   : > { %1061 = vmatprep.subr.bf16.mxu1 %v2555_v40 }
 0x18b   : > { %1841 = vmatmul.mubr.bf16.vlgmr.msra.gmra.mrb[0].mxu0 %v2962_v54  ;;  %v2484_v54 = vld [vmem:[%s3370_s4 + $0x240] ss:$8 sps:$4 sm:$0xff]  }
 0x18c   : > { %1850 = vmatpush1.bf16.msra.mxu0 %v2472_v44  ;;  %1881 = vmatprep.mubr.bf16.mxu0 %v1178_v46  ;;  %v2556_v44 = vld [vmem:[%s3367_s1 + $0x188] ss:$16 sps:$4 sm:$0xff]  }
 0x18d   : > { %1851 = vmatprep.subr.bf16.mxu0 %v2477_v45  ;;  %1062 = vmatpush1.bf16.msra.mxu1 %v2553_v42  ;;  %v2561_v45 = vld [vmem:[%s3367_s1 + $0x1ac] ss:$16 sps:$4 sm:$0xff]   ;;  %v2559_v46 = vld [vmem:[%s3367_s1 + $0x1a8] ss:$16 sps:$4 sm:$0xff]  }
 0x18e   : > { %1063 = vmatprep.subr.bf16.mxu1 %v2558_v43 }
 0x190   : > { %1852 = vmatpush1.bf16.msra.mxu0 %v2475_v47  ;;  %v2564_v47 = vld [vmem:[%s3367_s1 + $0x1cc] ss:$16 sps:$4 sm:$0xff]  }
 0x191   : > { %1853 = vmatprep.subr.bf16.mxu0 %v2480_v48  ;;  %1064 = vmatpush1.bf16.msra.mxu1 %v2556_v44  ;;  %v2562_v48 = vld [vmem:[%s3367_s1 + $0x1c8] ss:$16 sps:$4 sm:$0xff]   ;;  %v1936_v44 = vld [vmem:[%s3373_s7] sm:$0x3] }
 0x192   : > { %1065 = vmatprep.subr.bf16.mxu1 %v2561_v45 }
 0x194   : > { %1854 = vmatpush1.bf16.msra.mxu0 %v2478_v49  ;;  %v2567_v49 = vld [vmem:[%s3367_s1 + $0x1ec] ss:$16 sps:$4 sm:$0xff]  }
 0x195   : > { %1855 = vmatprep.subr.bf16.mxu0 %v2483_v50  ;;  %1066 = vmatpush1.bf16.msra.mxu1 %v2559_v46  ;;  %v2565_v50 = vld [vmem:[%s3367_s1 + $0x1e8] ss:$16 sps:$4 sm:$0xff]  }
 0x196   : > { %1067 = vmatprep.subr.bf16.mxu1 %v2564_v47 }
 0x198   : > { %1856 = vmatpush1.bf16.msra.mxu0 %v2481_v52  ;;  %v2570_v52 = vld [vmem:[%s3367_s1 + $0x20c] ss:$16 sps:$4 sm:$0xff]  }
 0x199   : > { %1857 = vmatprep.subr.bf16.mxu0 %v2486_v53  ;;  %1068 = vmatpush1.bf16.msra.mxu1 %v2562_v48  ;;  %v2568_v53 = vld [vmem:[%s3367_s1 + $0x208] ss:$16 sps:$4 sm:$0xff]  }
 0x19a   : > { %1069 = vmatprep.subr.bf16.mxu1 %v2567_v49 }
 0x19c   : > { %1858 = vmatpush1.bf16.msra.mxu0 %v2484_v54  ;;  %v2573_v54 = vld [vmem:[%s3367_s1 + $0x22c] ss:$16 sps:$4 sm:$0xff]  }
 0x19d   : > { %1859 = vmatprep.subr.bf16.mxu0 %v2489_v55  ;;  %1070 = vmatpush1.bf16.msra.mxu1 %v2565_v50  ;;  %v2571_v55 = vld [vmem:[%s3367_s1 + $0x228] ss:$16 sps:$4 sm:$0xff]  }
 0x19e   : > { %1080 = vmatprep.subr.bf16.mxu1 %v2570_v52 }
 0x1a0   : > { %1860 = vmatpush1.bf16.msra.mxu0 %v2487_v56  ;;  %1072 = vmatmul.mubr.bf16.vlgmr.msra.gmra.mrb[8].mxu1 %v2821_v51  ;;  %v2576_v56 = vld [vmem:[%s3367_s1 + $0x24c] ss:$16 sps:$4 sm:$0xff]  }
 0x1a1   : > { %1861 = vmatprep.subr.bf16.mxu0 %v2492_v57  ;;  %1081 = vmatpush1.bf16.msra.mxu1 %v2568_v53  ;;  %v2574_v57 = vld [vmem:[%s3367_s1 + $0x248] ss:$16 sps:$4 sm:$0xff]   ;;  %v2579_v51 = vld [vmem:[%s3367_s1 + $0x26c] ss:$16 sps:$4 sm:$0xff]  }
 0x1a2   : > { %1112 = vmatprep.mubr.bf16.mxu1 %v2608_v5  ;;  %1082 = vmatprep.subr.bf16.mxu1 %v2573_v54  ;;  %v2577_v5 = vld [vmem:[%s3367_s1 + $0x268] ss:$16 sps:$4 sm:$0xff]  }
 0x1a4   : > { %1862 = vmatpush1.bf16.msra.mxu0 %v2490_v58  ;;  %v2582_v58 = vld [vmem:[%s3367_s1 + $0x28c] ss:$16 sps:$4 sm:$0xff]  }
 0x1a5   : > { %1863 = vmatprep.subr.bf16.mxu0 %v2495_v59  ;;  %1083 = vmatpush1.bf16.msra.mxu1 %v2571_v55  ;;  %v2580_v59 = vld [vmem:[%s3367_s1 + $0x288] ss:$16 sps:$4 sm:$0xff]  }
 0x1a6   : > { %1084 = vmatprep.subr.bf16.mxu1 %v2576_v56 }
 0x1a8   : > { %1864 = vmatpush1.bf16.msra.mxu0 %v2493_v60  ;;  %v2585_v60 = vld [vmem:[%s3367_s1 + $0x2ac] ss:$16 sps:$4 sm:$0xff]  }
 0x1a9   : > { %1865 = vmatprep.subr.bf16.mxu0 %v2498_v61  ;;  %1085 = vmatpush1.bf16.msra.mxu1 %v2574_v57  ;;  %v2583_v61 = vld [vmem:[%s3367_s1 + $0x2a8] ss:$16 sps:$4 sm:$0xff]  }
 0x1aa   : > { %1086 = vmatprep.subr.bf16.mxu1 %v2579_v51 }
 0x1ac   : > { %1866 = vmatpush1.bf16.msra.mxu0 %v2496_v62  ;;  %v2588_v62 = vld [vmem:[%s3367_s1 + $0x2cc] ss:$16 sps:$4 sm:$0xff]  }
 0x1ad   : > { %1867 = vmatprep.subr.bf16.mxu0 %v2501_v63  ;;  %1087 = vmatpush1.bf16.msra.mxu1 %v2577_v5  ;;  %v2586_v63 = vld [vmem:[%s3367_s1 + $0x2c8] ss:$16 sps:$4 sm:$0xff]   ;;  %v2610_v5 = vmov 269488144  }
 0x1ae   : > { %1088 = vmatprep.subr.bf16.mxu1 %v2582_v58  ;;  %v1945_v58 = vunpack.c.l.s4 %v2610_v5 }
 0x1b0   : > { %1868 = vmatpush1.bf16.msra.mxu0 %v2499_v0  ;;  %v2591_v0 = vld [vmem:[%s3367_s1 + $0x2ec] ss:$16 sps:$4 sm:$0xff]  }
 0x1b1   : > { %1869 = vmatprep.subr.bf16.mxu0 %v2504_v2  ;;  %1089 = vmatpush1.bf16.msra.mxu1 %v2580_v59  ;;  %v2589_v2 = vld [vmem:[%s3367_s1 + $0x2e8] ss:$16 sps:$4 sm:$0xff]   ;;  %v1946_v59 = vunpack.c.0.s8 %v1945_v58 }
 0x1b2   : > { %1090 = vmatprep.subr.bf16.mxu1 %v2585_v60 }
 0x1b3   : > { %v1949_v60 = vsub.s32 %v1946_v59, %v2949_v36  ;;  %v1978_v36 = vld [vmem:[%s3375_s9] sm:$0x3] }
 0x1b4   : > { %1870 = vmatpush1.bf16.msra.mxu0 %v2502_v6  ;;  %v1275_v6 = vld [vmem:[%s3371_s5] sm:$0x3] }
 0x1b5   : > { %1871 = vmatprep.subr.bf16.mxu0 %v2507_v7  ;;  %1091 = vmatpush1.bf16.msra.mxu1 %v2583_v61  ;;  %v1280_v7 = vrot.slane %v1275_v6, %v2952_v37  ;;  %v1939_v61 = vld [vmem:[%s3374_s8] sm:$0xf] }
 0x1b6   : > { %1092 = vmatprep.subr.bf16.mxu1 %v2588_v62 }
 0x1b8   : > { %1872 = vmatpush1.bf16.msra.mxu0 %v2505_v8  ;;  %v1284_v8 = vrot.slane %v1275_v6, %v2958_v39 }
 0x1b9   : > { %1873 = vmatprep.subr.bf16.mxu0 %v2510_v9  ;;  %1093 = vmatpush1.bf16.msra.mxu1 %v2586_v63 }
 0x1ba   : > { %1094 = vmatprep.subr.bf16.mxu1 %v2591_v0 }
 0x1bc   : > { %1874 = vmatpush1.bf16.msra.mxu0 %v2508_v10 }
 0x1bd   : > { %1875 = vmatprep.subr.bf16.mxu0 %v2513_v11  ;;  %1095 = vmatpush1.bf16.msra.mxu1 %v2589_v2 }
 0x1c0   : > { %1876 = vmatpush1.bf16.msra.mxu0 %v2511_v12  ;;  %1113 = vmatmul.mubr.bf16.vlgmr.msra.gmra.mrb[12].mxu1 %v2870_v4 }
 0x1c1   : > { %1877 = vmatprep.subr.bf16.mxu0 %v2516_v13 }
 0x1c4   : > { %1878 = vmatpush1.bf16.msra.mxu0 %v2514_v41 }
 0x1c5   : > { %1879 = vmatprep.subr.bf16.mxu0 %v2519_v14 }
 0x1c8   : > { %1880 = vmatpush1.bf16.msra.mxu0 %v2517_v15 }
 0x1cb   : > { %1882 = vmatmul.mubr.bf16.vlgmr.msra.gmra.mrb[0].mxu0 %v1177_v16 }
 0x273   : > { %v1073_v48 = vpop.f32.mrb[8].mxu1 }
 0x274   : > { %v1075_v49 = vpop.f32.mrb[9].mxu1 }
 0x275   : > { %v1077_v50 = vpop.f32.mrb[10].mxu1 }
 0x276   : > { %v1078_v52 = vpop.f32.mrb[11].mxu1 }
 0x293   : > { %v1114_v53 = vpop.f32.mrb[12].mxu1 }
 0x294   : > { %v1116_v54 = vpop.f32.mrb[13].mxu1  ;;  %v1115_v55 = vadd.f32 %v1114_v53, %v1073_v48 }
 0x295   : > { %v1117_v56 = vadd.f32 %v1116_v54, %v1075_v49  ;;  %v1118_v57 = vpop.f32.mrb[14].mxu1 }
 0x296   : > { %v1119_v51 = vpop.f32.mrb[15].mxu1 }
 0x29e   : > { %v1883_v9 = vpop.f32.mrb[0].mxu0 }
 0x29f   : > { %v2281_v10 = vadd.f32 %v1883_v9, %v1280_v7  ;;  %v1885_v11 = vpop.f32.mrb[1].mxu0 }
 0x2a0   : > { %v2282_v12 = vadd.f32 %v1885_v11, %v1284_v8  ;;  %v1887_v13 = vpop.f32.mrb[2].mxu0 }
 0x2a1   : > { %v3322_v41 = vmax.f32 %v2281_v10, 0.0  ;;  %v1888_v14 = vpop.f32.mrb[3].mxu0 }
 0x2a2   : > { %v3324_v15 = vmax.f32 %v2282_v12, 0.0 }
 0x2a3   : > { %v1892_v4 = vrot.slane %v3322_v41, 4 }
 0x2a4   : > { %v1898_v16 = vrot.slane %v3324_v15, 4 }
 0x2a5   : > { %v1893_v17 = vadd.f32 %v1892_v4, %v3322_v41 }
 0x2a6   : > { %v1899_v18 = vadd.f32 %v1898_v16, %v3324_v15  ;;  %v1983_v16 = vrot.slane %v1978_v36, %v2952_v37 }
 0x2a7   : > { %v1894_v19 = vrot.slane %v1893_v17, 2 }
 0x2a8   : > { %v1900_v3 = vrot.slane %v1899_v18, 2 }
 0x2a9   : > { %v1895_v21 = vadd.f32 %v1894_v19, %v1893_v17  ;;  %v1987_v19 = vrot.slane %v1978_v36, %v2958_v39 }
 0x2aa   : > { %v1901_v22 = vadd.f32 %v1900_v3, %v1899_v18 }
 0x2ab   : > { %v1896_v23 = vrot.slane %v1895_v21, 1 }
 0x2ac   : > { %v1902_v24 = vrot.slane %v1901_v22, 1 }
 0x2ad   : > { %v1897_v26 = vadd.f32 %v1896_v23, %v1895_v21 }
 0x2ae   : > { %v1903_v27 = vadd.f32 %v1902_v24, %v1901_v22 }
 0x2af   : > { %v1904_v28 = vmul.f32 0.015625, %v1897_v26 }
 0x2b0   : > { %v1905_v29 = vmul.f32 0.015625, %v1903_v27 }
 0x2b2   : > { %v1909_v31 = vcombine.low %v1904_v28, %v1905_v29  ;;  %v1137_v29 = vld [vmem:[%s3369_s3] sm:$0x3] }
 0x2b4   : > { %v1916_v33 = vrot.slane %v1909_v31, %v1915_v30 }
 0x2b6   : > { %v1918_v34 = vmul.f32 %v1916_v33, %v1906_v32  ;;  %v1146_v33 = vrot.slane %v1137_v29, %v2958_v39 }
 0x2b8   : > { %v1926_v35 = vrot.slane %v1918_v34, %v1915_v30 }
 0x2ba   : > { %v1927_v38 = vcombine.high %v1926_v35, %v1926_v35  ;;  %v1931_v40 = vsel %vm1930_vm6, %v1926_v35, 0.0 }
 0x2bc   : > { %v1932_v42 = vsel %vm1930_vm6, %v1927_v38, 0.0 }
 0x2bd   : > { %v1933_v43 = vadd.f32 %v1932_v42, %v1931_v40 }
 0x2bf   : > { %1934 = vadd.xlane.f32.xlu0 %v1933_v43  ;;  %v1150_v43 = vadd.f32 %v1146_v33, %v1117_v56 }
 0x34c   : > { %v1935_v45 = vpop.xlane.xlu0 %1934 }
 0x34d   : > { %v1937_v46 = vadd.f32 %v1936_v44, %v1935_v45 }
 0x34f   : > { %v1938_v47 = vmax.f32 %v1937_v46, 0.0 }
 0x351   : > { %1942 = vperm.xlu0 %2302, %v1938_v47  }
 0x3d0   : > { %v1943_v62 = vpop.permute.xlu0 %1942 }
 0x3d1   : > { %v1950_v63 = vrot.slane %v1943_v62, %v1949_v60 }
 0x3d3   : > { %v1952_v0 = vmul.f32 %v1950_v63, %v1939_v61 }
 0x3d5   : > { %v1960_v2 = vrot.slane %v1952_v0, %v1915_v30  ;;  %v1142_v30 = vrot.slane %v1137_v29, %v2952_v37 }
 0x3d7   : > { %v1961_v6 = vcombine.high %v1960_v2, %v1960_v2  ;;  %v1964_v7 = vsel %vm1930_vm6, %v1960_v2, 0.0  ;;  %v1149_v35 = vadd.f32 %v1142_v30, %v1115_v55 }
 0x3d8   : > { %v1965_v8 = vrot.slane %v1964_v7, 4 }
 0x3d9   : > { %v1971_v9 = vsel %vm1930_vm6, %v1961_v6, 0.0 }
 0x3da   : > { %v1966_v10 = vadd.f32 %v1965_v8, %v1964_v7  ;;  %v1972_v11 = vrot.slane %v1971_v9, 4 }
 0x3dc   : > { %v1967_v12 = vrot.slane %v1966_v10, 2  ;;  %v1973_v13 = vadd.f32 %v1972_v11, %v1971_v9 }
 0x3de   : > { %v1968_v14 = vadd.f32 %v1967_v12, %v1966_v10  ;;  %v1974_v4 = vrot.slane %v1973_v13, 2 }
 0x3e0   : > { %v1969_v17 = vrot.slane %v1968_v14, 1  ;;  %v1975_v18 = vadd.f32 %v1974_v4, %v1973_v13 }
 0x3e2   : > { %v1970_v3 = vadd.f32 %v1969_v17, %v1968_v14  ;;  %v1976_v1 = vrot.slane %v1975_v18, 1 }
 0x3e4   : > { %v1977_v20 = vadd.f32 %v1976_v1, %v1975_v18  ;;  %v1990_v21 = vadd.f32 %v1983_v16, %v1970_v3 }
 0x3e6   : > { %v1991_v22 = vadd.f32 %v1987_v19, %v1977_v20  ;;  %v2276_v23 = vmul.f32 -1.442695, %v1990_v21 }
 0x3e8   : > { %2592 = vpow2.f32 %v2276_v23  ;;  %v2277_v24 = vmul.f32 -1.442695, %v1991_v22 }
 0x3ea   : > { %2594 = vpow2.f32 %v2277_v24 }
 0x3f2   : > { %v2593_v25 = vpop.eup %2592 }
 0x3f3   : > { %v1998_v26 = vadd.f32 1.0, %v2593_v25 }
 0x3f4   : > { %v2595_v27 = vpop.eup %2594 }
 0x3f5   : > { %v1999_v28 = vadd.f32 1.0, %v2595_v27  ;;  %2596 = vrcp.f32 %v1998_v26 }
 0x3f7   : > { %2598 = vrcp.f32 %v1999_v28 }
 0x3ff   : > { %v2597_v31 = vpop.eup %2596 }
 0x400   : > { %v2007_v32 = vrot.slane %v2597_v31, %v2952_v37 }
 0x401   : > { %v2599_v34 = vpop.eup %2598 }
 0x402   : > { %v2012_v38 = vmul.f32 %v2007_v32, %v3322_v41  ;;  %v2011_v40 = vrot.slane %v2599_v34, %v2952_v37 }
 0x404   : > { %v2014_v42 = vadd.f32 %v2012_v38, %v1149_v35  ;;  %v2013_v44 = vmul.f32 %v2011_v40, %v3324_v15 }
 0x406   : > { %v2016_v45 = vmax.f32 %v2014_v42, 0.0  ;;  %v2015_v46 = vadd.f32 %v2013_v44, %v1150_v43 }
 0x408   : > { %2018 = vst [vmem:[%s356_s24] sm:$0xff] %v2016_v45  ;;  %v2017_v47 = vmax.f32 %v2015_v46, 0.0 }
 0x40a   : > { %2019 = vst [vmem:[%s356_s24 + $0x8] sm:$0xff] %v2017_v47 }
 0x40b PF: > { %s20_s13 = sadd.s32 1, %s2606_s13  }
 0x40c   : > { %p17_p4 = scmp.ge.s32.totalorder %s20_s13, 4  }
 0x40e   :  { %19 = sbr.rel (!%p17_p4) target bundleno = 1 (0x1), region = 90 }

</bundles_post_ra>
